<compile_context>
chip_gen: v6e
topology: v6e:2x2x1
jax: 0.10.0
libtpu: 0.0.40
codegen_flags: <defaults>
</compile_context>

<pallas_src>
import functools

import jax
import jax.numpy as jnp
from jax.experimental import pallas as pl
from jax.experimental.pallas import tpu as pltpu


def _linear_add_relu_kernel(x_ref, wb_ref, other_ref, o_ref, *, in_features):
    # x:     (B, IN)
    # wb:    (IN+1, OUT)  rows [0:IN] = W.T, row [IN] = bias
    # other: (B, OUT)
    # o:     (B, OUT)
    x = x_ref[...]

    # Start the accumulator from bias + other (bias row broadcasts over B),
    # then add IN unrolled VPU broadcast-FMAs.  IN = 3, so the static unroll
    # is only a handful of ops; no MXU, no in-kernel transpose.
    acc = wb_ref[in_features:in_features + 1, :] + other_ref[...]
    for k in range(in_features):  # static unroll
        acc = acc + x[:, k:k + 1] * wb_ref[k:k + 1, :]

    o_ref[...] = jnp.maximum(acc, 0.0).astype(o_ref.dtype)


def make_linear_add_relu(w, b):
    """Build the forward fn.  All parameter layout work happens ONCE here."""
    out_f, in_f = w.shape
    # Pack [W.T ; b] into one (IN+1, OUT) constant slab at init time.
    wb = jnp.concatenate(
        [w.T.astype(jnp.float32), b.reshape(1, out_f).astype(jnp.float32)],
        axis=0,
    )

    vmem = pl.BlockSpec(memory_space=pltpu.MemorySpace.VMEM)
    kernel = functools.partial(_linear_add_relu_kernel, in_features=in_f)

    def forward(x, other):
        batch = x.shape[0]
        return pl.pallas_call(
            kernel,
            out_shape=jax.ShapeDtypeStruct((batch, out_f), x.dtype),
            in_specs=[vmem, vmem, vmem],
            out_specs=vmem,
        )(x, wb, other)

    return forward


if __name__ == "__main__":
    key = jax.random.PRNGKey(0)
    k_x, k_w, k_b = jax.random.split(key, 3)

    IN_F, OUT_F, BATCH = 3, 5, 1

    # Deterministic "parameters" for Linear(3, 5)
    w = jax.random.normal(k_w, (OUT_F, IN_F), dtype=jnp.float32) * 0.1
    b = jax.random.normal(k_b, (OUT_F,), dtype=jnp.float32) * 0.1

    # Inputs consistent with the PyTorch script
    x1 = jax.random.normal(k_x, (BATCH, IN_F), dtype=jnp.float32)
    other = jnp.zeros((BATCH, OUT_F), dtype=jnp.float32)

    forward = make_linear_add_relu(w, b)
    out = forward(x1, other)
    jax.block_until_ready(out)

    # Reference check in plain JAX
    ref = jnp.maximum(x1 @ w.T + b[None, :] + other, 0.0)
    assert out.shape == (BATCH, OUT_F)
    assert out.dtype == x1.dtype
    assert jnp.allclose(out, ref, atol=1e-5), (out, ref)

    print("KERNEL_OK")
</pallas_src>

<mosaic_0001>
module attributes {stable_mosaic.version = 11 : i64} {
  func.func @_linear_add_relu_kernel(%arg0: memref<1x3xf32, #tpu.memory_space<vmem>>, %arg1: memref<4x5xf32, #tpu.memory_space<vmem>>, %arg2: memref<1x5xf32, #tpu.memory_space<vmem>>, %arg3: memref<1x5xf32, #tpu.memory_space<vmem>>) attributes {dimension_semantics = [], scalar_prefetch = 0 : i64, scratch_operands = 0 : i64, tpu.core_type = #tpu.core_type<tc>} {
    %c0 = arith.constant 0 : index
    %c0_0 = arith.constant 0 : index
    %0 = vector.load %arg0[%c0, %c0_0] : memref<1x3xf32, #tpu.memory_space<vmem>>, vector<1x3xf32>
    %c3 = arith.constant 3 : index
    %c0_1 = arith.constant 0 : index
    %1 = vector.load %arg1[%c3, %c0_1] : memref<4x5xf32, #tpu.memory_space<vmem>>, vector<1x5xf32>
    %c0_2 = arith.constant 0 : index
    %c0_3 = arith.constant 0 : index
    %2 = vector.load %arg2[%c0_2, %c0_3] : memref<1x5xf32, #tpu.memory_space<vmem>>, vector<1x5xf32>
    %3 = arith.addf %1, %2 : vector<1x5xf32>
    %4 = vector.extract_strided_slice %0 {offsets = [0, 0], sizes = [1, 1], strides = [1, 1]} : vector<1x3xf32> to vector<1x1xf32>
    %c0_4 = arith.constant 0 : index
    %c0_5 = arith.constant 0 : index
    %5 = vector.load %arg1[%c0_4, %c0_5] : memref<4x5xf32, #tpu.memory_space<vmem>>, vector<1x5xf32>
    %6 = vector.broadcast %4 : vector<1x1xf32> to vector<1x5xf32>
    %7 = arith.mulf %6, %5 : vector<1x5xf32>
    %8 = arith.addf %3, %7 : vector<1x5xf32>
    %9 = vector.extract_strided_slice %0 {offsets = [0, 1], sizes = [1, 1], strides = [1, 1]} : vector<1x3xf32> to vector<1x1xf32>
    %c1 = arith.constant 1 : index
    %c0_6 = arith.constant 0 : index
    %10 = vector.load %arg1[%c1, %c0_6] : memref<4x5xf32, #tpu.memory_space<vmem>>, vector<1x5xf32>
    %11 = vector.broadcast %9 : vector<1x1xf32> to vector<1x5xf32>
    %12 = arith.mulf %11, %10 : vector<1x5xf32>
    %13 = arith.addf %8, %12 : vector<1x5xf32>
    %14 = vector.extract_strided_slice %0 {offsets = [0, 2], sizes = [1, 1], strides = [1, 1]} : vector<1x3xf32> to vector<1x1xf32>
    %c2 = arith.constant 2 : index
    %c0_7 = arith.constant 0 : index
    %15 = vector.load %arg1[%c2, %c0_7] : memref<4x5xf32, #tpu.memory_space<vmem>>, vector<1x5xf32>
    %16 = vector.broadcast %14 : vector<1x1xf32> to vector<1x5xf32>
    %17 = arith.mulf %16, %15 : vector<1x5xf32>
    %18 = arith.addf %13, %17 : vector<1x5xf32>
    %cst = arith.constant 0.000000e+00 : f32
    %19 = vector.broadcast %cst : f32 to vector<1x5xf32>
    %20 = arith.maximumf %18, %19 : vector<1x5xf32>
    %c0_8 = arith.constant 0 : index
    %c0_9 = arith.constant 0 : index
    %21 = vector.load %arg3[%c0_8, %c0_9] : memref<1x5xf32, #tpu.memory_space<vmem>>, vector<1x5xf32>
    tpu.vector_store %arg3[%c0_8, %c0_9], %20 {strides = array<i32>} : memref<1x5xf32, #tpu.memory_space<vmem>>, vector<1x5xf32>,
    return
  }
}

</mosaic_0001>

<bundles_post_ra>
// kernel: tpu_custom_call.1
= control target key start
LH: loop header
LB: loop body
LE: loop exit
PB: predicated region body
PF: predicated region fallthrough
CT: control target
= control target key end

     0   :  { %8 = vsyncpa [#allocation3], 0  ;;  %s210_s0 = inlined_call_operand.hbm [shape: f32[1,3], index: 0, kind: input, shape index: {}]   ;;  %s211_s1 = inlined_call_operand.hbm [shape: f32[4,5], index: 1, kind: input, shape index: {}]   ;;  %s212_s2 = inlined_call_operand.vmem [shape: f32[1,5], index: 2, kind: input, shape index: {}]   ;;  %s213_s3 = inlined_call_operand.hbm [shape: f32[1,5], index: 3, kind: output, shape index: {}]  }
   0x1   :  { %9 = vsyncpa [#allocation6], 0 }
   0x2   :  { %10 = vsyncpa [#allocation4], 0  ;;  %s172_s12 = smov [#allocation2]   ;;  %s173_s14 = smov [#allocation5]  }
   0x3   :  { %s17_s13 = sshll.u32 %s172_s12, 4  ;;  %s27_s15 = sshll.u32 %s173_s14, 4  ;;  %s18_s13 = int_to_ptr.vmem [resolvable:$true] %s17_s13  ;;  %s28_s15 = int_to_ptr.vmem [resolvable:$true] %s27_s15 }
   0x4   :  { %s114_s16 = scalar_lea.vmem %s18_s13, 16  ;;  %s118_s17 = scalar_lea.vmem %s18_s13, 32 }
   0x5   :  { %p115_p0 = scmp.ne.s32.totalorder %s18_s13, %s114_s16  ;;  %p119_p1 = scmp.lt.s32.totalorder %s18_s13, %s18_s13 }
   0x6   :  { %p120_p2 = scmp.lt.s32.totalorder %s118_s17, %s114_s16 }
   0x8   :  { %p121_p3 = por %p120_p2, %p119_p1 }
   0xa   :  { %p122_p4 = pnand %p121_p3, %p115_p0 }
   0xc   :  { %125 = shalt.err (!%p122_p4)
}
   0xd   :  { %20 = dma.hbm_to_vmem [thread:$0]  %s210_s0, 16, %s18_s13, [#allocation3]  }
   0xe   :  { %s134_s20 = scalar_lea.vmem %s28_s15, 64  ;;  %p139_p6 = scmp.lt.s32.totalorder %s28_s15, %s28_s15 }
   0xf   :  { %p135_p5 = scmp.ne.s32.totalorder %s28_s15, %s134_s20  ;;  %p140_p7 = scmp.lt.s32.totalorder %s134_s20, %s134_s20 }
  0x11   :  { %p141_p8 = por %p140_p7, %p139_p6 }
  0x13   :  { %p142_p9 = pnand %p141_p8, %p135_p5 }
  0x15   :  { %145 = shalt.err (!%p142_p9)
}
  0x16   :  { %30 = dma.hbm_to_vmem [thread:$0]  %s211_s1, 64, %s28_s15, [#allocation6]  }
  0x17   :  { %166 = dma.done.wait [#allocation3], 16  }
  0x18   :  { %167 = vsyncadd [#allocation3], 4294967280 }
  0x19   :  { %168 = dma.done.wait [#allocation6], 64  }
  0x1a   :  { %169 = vsyncadd [#allocation6], 4294967232  ;;  %v174_v0 = vmov 0   ;;  %v175_v1 = vmov 2   ;;  %v39_v2 = vld [vmem:[#allocation2] sm:$0x1]  ;;  %v49_v4 = vlaneseq }
  0x1b   :  { %102 = vset.pattern.permute.xlu0 %v174_v0  ;;  %104 = vset.pattern.permute.xlu1 %v175_v1  ;;  %v176_v3 = vmov 1   ;;  %v40_v8 = vld [vmem:[#allocation5 + $0x3] sm:$0x1]  ;;  %v41_v9 = vld [vmem:[%s212_s2] sm:$0x1]  ;;  %s177_s23 = smov [#allocation7]  }
  0x1c   :  { %46 = vperm.xlu0 %102, %v39_v2   ;;  %68 = vperm.xlu1 %104, %v39_v2   ;;  %v50_v5 = vshrl.u32 %v49_v4, 7  ;;  %v43_v10 = vld [vmem:[#allocation5] sm:$0x1]  ;;  %v42_v13 = vadd.f32 %v41_v9, %v40_v8  ;;  %v55_v16 = vld [vmem:[#allocation5 + $0x1] sm:$0x1]  ;;  %s86_s24 = sshll.u32 %s177_s23, 4  ;;  %s87_s24 = int_to_ptr.vmem [resolvable:$true] %s86_s24 }
  0x1d   :  { %v66_v18 = vld [vmem:[#allocation5 + $0x2] sm:$0x1]  ;;  %vm78_vm0 = vcmask 32768   ;;  %s146_s2 = scalar_lea.vmem %s87_s24, 16  ;;  %s150_s25 = scalar_lea.vmem %s87_s24, 32 }
  0x1e   :  { %v51_v6 = vsub.s32 0, %v50_v5  ;;  %p147_p10 = scmp.ne.s32.totalorder %s87_s24, %s146_s2  ;;  %p151_p11 = scmp.lt.s32.totalorder %s87_s24, %s87_s24 }
  0x1f   :  { %p152_p12 = scmp.lt.s32.totalorder %s150_s25, %s146_s2 }
  0x20   :  { %103 = vset.pattern.permute.xlu0 %v176_v3 }
  0x21   :  { %57 = vperm.xlu0 %103, %v39_v2   ;;  %p153_p13 = por %p152_p12, %p151_p11 }
  0x23   :  { %p154_p0 = pnand %p153_p13, %p147_p10 }
  0x25   :  { %105 = vset.pattern.permute.xlu0 %v175_v1 }
  0x97   :  { %v47_v7 = vpop.permute.xlu0 %46  ;;  %v69_v12 = vpop.permute.xlu1 %68 }
  0x98   :  { %v52_v11 = vrot.slane %v47_v7, %v51_v6  ;;  %v74_v15 = vrot.slane %v69_v12, %v51_v6 }
  0x9a   :  { %v53_v14 = vmul.f32 %v52_v11, %v43_v10  ;;  %v75_v22 = vmul.f32 %v74_v15, %v66_v18 }
  0x9c   :  { %v58_v17 = vpop.permute.xlu0 %57  ;;  %v54_v20 = vadd.f32 %v53_v14, %v42_v13 }
  0x9d   :  { %v63_v19 = vrot.slane %v58_v17, %v51_v6 }
  0x9f   :  { %v64_v21 = vmul.f32 %v63_v19, %v55_v16 }
  0xa1   :  { %v65_v23 = vadd.f32 %v64_v21, %v54_v20 }
  0xa3   :  { %v76_v24 = vadd.f32 %v75_v22, %v65_v23 }
  0xa5   :  { %v77_v25 = vmax.f32 %v76_v24, 0.0 }
  0xa7   :  { %79 = vst.msk [vmem:[#allocation7] sm:$0x1] %vm78_vm0, %v77_v25 }
  0xa8   :  { %157 = shalt.err (!%p154_p0)
}
  0xa9   :  { %89 = dma.vmem_to_hbm [thread:$0]  %s87_s24, 16, %s213_s3, [#allocation4]  }
  0xaa   :  { %170 = dma.done.wait [#allocation4], 16  }
  0xab   :  { %171 = vsyncadd [#allocation4], 4294967280 }
  0xac   :  { %93 = vsyncpa [#allocation3], 1 }
  0xad   :  { %94 = vsyncpa [#allocation6], 1 }
  0xae   :  { %95 = vsyncpa [#allocation4], 1 }

</bundles_post_ra>
